<compile_context>
chip_gen: v7x
topology: tpu7x:2x2x1
jax: 0.10.0
libtpu: 0.0.40
codegen_flags: <defaults>
</compile_context>

<pallas_src>
import jax
import jax.numpy as jnp
from jax.experimental import pallas as pl
from jax.experimental.pallas import tpu as pltpu


def _residual_add_mlp_kernel(x_ref, w1_ref, b1_ref, w2_ref, b2_ref, o_ref,
                             acc_ref):
    # x_ref: (TM, E) tile; w1: (E, TH) chunk; b1: (1, TH) chunk;
    # w2: (TH, E) chunk; b2: (1, E); acc_ref: (TM, E) f32 scratch.
    k = pl.program_id(1)

    @pl.when(k == 0)
    def _():
        acc_ref[...] = jnp.zeros_like(acc_ref)

    # fn: Linear 1 -> GELU.  bf16 operands on the MXU, f32 accumulate.
    h = jnp.dot(x_ref[...].astype(jnp.bfloat16), w1_ref[...],
                preferred_element_type=jnp.float32)
    h = jax.nn.gelu(h + b1_ref[...].astype(jnp.float32))

    # fn: Linear 2, accumulated over H chunks in f32.
    acc_ref[...] += jnp.dot(h.astype(jnp.bfloat16), w2_ref[...],
                            preferred_element_type=jnp.float32)

    @pl.when(k == pl.num_programs(1) - 1)
    def _():
        # Residual add: reload the x tile from VMEM (cheap vld) at the end
        # instead of pinning it in vregs across both matmuls.
        o_ref[...] = (acc_ref[...] + b2_ref[...].astype(jnp.float32)
                      + x_ref[...].astype(jnp.float32)).astype(o_ref.dtype)


def _round_up(n, m):
    return ((n + m - 1) // m) * m


def _vmem_limit_bytes():
    # Per-generation scoped-VMEM limit (v5e/v6e: 128 MiB phys, v7x: 64 MiB).
    try:
        cap = pltpu.get_tpu_info().vmem_capacity_bytes
        return int(min(cap * 3 // 4, 96 * 1024 * 1024))
    except Exception:
        return 32 * 1024 * 1024


def residual_add_mlp(x, w1, b1, w2, b2, *, tm=512, th=1024):
    """x: (B, S, E) -> (B, S, E), computing fn(x) + x with fn = Linear-GELU-Linear."""
    B, S, E = x.shape
    H = w1.shape[1]
    M = B * S

    # Lane-dense E only when E is already >= 128 (padding tiny E just
    # multiplies streamed HBM bytes by E_pad/E on every generation).
    E_eff = _round_up(E, 128) if E >= 128 else E

    # H chunking: stream (E_eff, TH)/(TH, E_eff) weight blocks when H is big;
    # otherwise a single full-H chunk (weights stay VMEM resident).
    if H > th:
        TH = th                                   # multiple of 128
        H_eff = _round_up(H, TH)                  # zero-pad: gelu(0)=0, exact
    else:
        TH = H
        H_eff = H

    # TM: multiple of 8, big enough to amortize per-step overhead, small
    # enough that the M grid has >= 4 steps (>= 2 per TensorCore on v7x).
    TM = max(8, (min(tm, M) // 8) * 8)
    while TM >= 256 and pl.cdiv(M, TM) < 4:
        TM //= 2
    n_m = pl.cdiv(M, TM)                          # ragged last tile is masked
    n_h = H_eff // TH

    x2d = x.reshape(M, E)
    e_padded = E_eff != E
    if e_padded:
        x2d = jnp.pad(x2d, ((0, 0), (0, E_eff - E)))

    w1p = jnp.pad(w1, ((0, E_eff - E), (0, H_eff - H))) if (E_eff, H_eff) != (E, H) else w1
    b1p = jnp.pad(b1, ((0, 0), (0, H_eff - H))) if H_eff != H else b1
    w2p = jnp.pad(w2, ((0, H_eff - H), (0, E_eff - E))) if (E_eff, H_eff) != (E, H) else w2
    b2p = jnp.pad(b2, ((0, 0), (0, E_eff - E))) if E_eff != E else b2

    # bf16 weights for the MXU (cast once, outside the kernel).
    w1p = w1p.astype(jnp.bfloat16)
    w2p = w2p.astype(jnp.bfloat16)

    out2d = pl.pallas_call(
        _residual_add_mlp_kernel,
        out_shape=jax.ShapeDtypeStruct((M, E_eff), x.dtype),
        grid_spec=pltpu.PrefetchScalarGridSpec(
            num_scalar_prefetch=0,
            grid=(n_m, n_h),
            in_specs=[
                pl.BlockSpec((TM, E_eff), lambda i, k: (i, 0)),   # x tile (pipelined)
                pl.BlockSpec((E_eff, TH), lambda i, k: (0, k)),   # w1 column chunk
                pl.BlockSpec((1, TH),     lambda i, k: (0, k)),   # b1 chunk
                pl.BlockSpec((TH, E_eff), lambda i, k: (k, 0)),   # w2 row chunk
                pl.BlockSpec((1, E_eff),  lambda i, k: (0, 0)),   # b2 (resident)
            ],
            out_specs=pl.BlockSpec((TM, E_eff), lambda i, k: (i, 0)),
            scratch_shapes=[pltpu.VMEM((TM, E_eff), jnp.float32)],
        ),
        compiler_params=pltpu.CompilerParams(
            dimension_semantics=("parallel", "arbitrary"),
            vmem_limit_bytes=_vmem_limit_bytes(),
        ),
        # Only alias when x2d is a fresh (padded) buffer; otherwise XLA's
        # defensive copy of the caller's x would negate the in-place win.
        input_output_aliases=({0: 0} if e_padded else {}),
    )(x2d, w1p, b1p, w2p, b2p)

    if e_padded:
        out2d = out2d[:, :E]
    return out2d.reshape(B, S, E)


if __name__ == "__main__":
    fwd = jax.jit(residual_add_mlp, static_argnames=("tm", "th"))

    def ref_fn(x, w1, b1, w2, b2):
        # Pure-JAX reference of ResidualAdd(fn)(x) == fn(x) + x.
        return x + (jax.nn.gelu(x @ w1 + b1) @ w2 + b2)

    def make_inputs(B, S, E, H, seed=0):
        key = jax.random.PRNGKey(seed)
        kx, kw1, kb1, kw2, kb2 = jax.random.split(key, 5)
        x = jax.random.normal(kx, (B, S, E), dtype=jnp.float32)
        w1 = jax.random.normal(kw1, (E, H), dtype=jnp.float32) * 0.05
        b1 = jax.random.normal(kb1, (1, H), dtype=jnp.float32) * 0.01
        w2 = jax.random.normal(kw2, (H, E), dtype=jnp.float32) * 0.05
        b2 = jax.random.normal(kb2, (1, E), dtype=jnp.float32) * 0.01
        return x, w1, b1, w2, b2

    # --- small demo shapes (transformer block wrapped in ResidualAdd) -------
    args = make_inputs(2, 8, 32, 64)
    out = fwd(*args)
    jax.block_until_ready(out)
    ref = ref_fn(*args)
    assert out.shape == args[0].shape and out.dtype == args[0].dtype
    assert jnp.allclose(out, ref, atol=2e-2, rtol=2e-2)   # bf16 MXU operands

    # --- larger lane-dense shapes: exercise the tiled / pipelined path ------
    args_l = make_inputs(2, 1024, 128, 512)   # M=2048 -> 4 tiles of 512
    out_l = fwd(*args_l)
    jax.block_until_ready(out_l)
    ref_l = ref_fn(*args_l)
    assert out_l.shape == args_l[0].shape and out_l.dtype == args_l[0].dtype
    assert jnp.allclose(out_l, ref_l, atol=2e-2, rtol=2e-2)

    # --- ragged M, padded E, chunked H: exercise masking + accumulator path -
    args_c = make_inputs(2, 300, 200, 1100)   # M=600 ragged, E->256, H chunks
    out_c = fwd(*args_c, th=512)
    jax.block_until_ready(out_c)
    ref_c = ref_fn(*args_c)
    assert out_c.shape == args_c[0].shape and out_c.dtype == args_c[0].dtype
    assert jnp.allclose(out_c, ref_c, atol=3e-2, rtol=3e-2)

    print("KERNEL_OK")
</pallas_src>

<mosaic_0001>
module attributes {stable_mosaic.version = 11 : i64} {
  func.func @_residual_add_mlp_kernel(%arg0: i32, %arg1: i32, %arg2: memref<16x32xf32, #tpu.memory_space<vmem>>, %arg3: memref<32x64xbf16, #tpu.memory_space<vmem>>, %arg4: memref<1x64xf32, #tpu.memory_space<vmem>>, %arg5: memref<64x32xbf16, #tpu.memory_space<vmem>>, %arg6: memref<1x32xf32, #tpu.memory_space<vmem>>, %arg7: memref<16x32xf32, #tpu.memory_space<vmem>>, %arg8: memref<16x32xf32, #tpu.memory_space<vmem>>) attributes {dimension_semantics = [#tpu.dimension_semantics<parallel>, #tpu.dimension_semantics<arbitrary>], iteration_bounds = array<i64: 1, 1>, scalar_prefetch = 0 : i64, scratch_operands = 1 : i64, tpu.core_type = #tpu.core_type<tc>, window_params = [{transform_indices = @transform_0, window_bounds = array<i64: 16, 32>}, {transform_indices = @transform_1, window_bounds = array<i64: 32, 64>}, {transform_indices = @transform_2, window_bounds = array<i64: 1, 64>}, {transform_indices = @transform_3, window_bounds = array<i64: 64, 32>}, {pipeline_mode = #tpu.pipeline_mode<synchronous>, transform_indices = @transform_4, window_bounds = array<i64: 1, 32>}, {transform_indices = @transform_5, window_bounds = array<i64: 16, 32>}]} {
    %c0_i32 = arith.constant 0 : i32
    %0 = arith.cmpi eq, %arg1, %c0_i32 : i32
    %1 = arith.extui %0 : i1 to i32
    %c0_i32_0 = arith.constant 0 : i32
    %2 = arith.cmpi ne, %1, %c0_i32_0 : i32
    scf.if %2 {
      %cst_19 = arith.constant 0.000000e+00 : f32
      %32 = vector.broadcast %cst_19 : f32 to vector<16x32xf32>
      %c0_20 = arith.constant 0 : index
      %c0_21 = arith.constant 0 : index
      %33 = vector.load %arg8[%c0_20, %c0_21] : memref<16x32xf32, #tpu.memory_space<vmem>>, vector<16x32xf32>
      tpu.vector_store %arg8[%c0_20, %c0_21], %32 {strides = array<i32>} : memref<16x32xf32, #tpu.memory_space<vmem>>, vector<16x32xf32>,
    } else {
    }
    %c0 = arith.constant 0 : index
    %c0_1 = arith.constant 0 : index
    %3 = vector.load %arg2[%c0, %c0_1] : memref<16x32xf32, #tpu.memory_space<vmem>>, vector<16x32xf32>
    %4 = arith.truncf %3 : vector<16x32xf32> to vector<16x32xbf16>
    %c0_2 = arith.constant 0 : index
    %c0_3 = arith.constant 0 : index
    %5 = vector.load %arg3[%c0_2, %c0_3] : memref<32x64xbf16, #tpu.memory_space<vmem>>, vector<32x64xbf16>
    %cst = arith.constant dense<0.000000e+00> : vector<16x64xf32>
    %6 = tpu.matmul %4, %5, %cst {dimension_numbers = #tpu.dot_dimension_numbers<[1], [0], [0], [1], [0, 0, 1, 1], [], []>} : vector<16x32xbf16>, vector<32x64xbf16>, vector<16x64xf32> -> vector<16x64xf32>
    %c0_4 = arith.constant 0 : index
    %c0_5 = arith.constant 0 : index
    %7 = vector.load %arg4[%c0_4, %c0_5] : memref<1x64xf32, #tpu.memory_space<vmem>>, vector<1x64xf32>
    %8 = vector.broadcast %7 : vector<1x64xf32> to vector<16x64xf32>
    %9 = arith.addf %6, %8 : vector<16x64xf32>
    %10 = arith.mulf %9, %9 : vector<16x64xf32>
    %11 = arith.mulf %9, %10 : vector<16x64xf32>
    %cst_6 = arith.constant 4.471500e-02 : f32
    %12 = vector.broadcast %cst_6 : f32 to vector<16x64xf32>
    %13 = arith.mulf %12, %11 : vector<16x64xf32>
    %14 = arith.addf %9, %13 : vector<16x64xf32>
    %cst_7 = arith.constant 0.797884583 : f32
    %15 = vector.broadcast %cst_7 : f32 to vector<16x64xf32>
    %16 = arith.mulf %15, %14 : vector<16x64xf32>
    %17 = math.tanh %16 : vector<16x64xf32>
    %cst_8 = arith.constant 1.000000e+00 : f32
    %18 = vector.broadcast %cst_8 : f32 to vector<16x64xf32>
    %19 = arith.addf %18, %17 : vector<16x64xf32>
    %cst_9 = arith.constant 5.000000e-01 : f32
    %20 = vector.broadcast %cst_9 : f32 to vector<16x64xf32>
    %21 = arith.mulf %20, %19 : vector<16x64xf32>
    %22 = arith.mulf %9, %21 : vector<16x64xf32>
    %c0_10 = arith.constant 0 : index
    %c0_11 = arith.constant 0 : index
    %23 = vector.load %arg8[%c0_10, %c0_11] : memref<16x32xf32, #tpu.memory_space<vmem>>, vector<16x32xf32>
    %24 = arith.truncf %22 : vector<16x64xf32> to vector<16x64xbf16>
    %c0_12 = arith.constant 0 : index
    %c0_13 = arith.constant 0 : index
    %25 = vector.load %arg5[%c0_12, %c0_13] : memref<64x32xbf16, #tpu.memory_space<vmem>>, vector<64x32xbf16>
    %cst_14 = arith.constant dense<0.000000e+00> : vector<16x32xf32>
    %26 = tpu.matmul %24, %25, %cst_14 {dimension_numbers = #tpu.dot_dimension_numbers<[1], [0], [0], [1], [0, 0, 1, 1], [], []>} : vector<16x64xbf16>, vector<64x32xbf16>, vector<16x32xf32> -> vector<16x32xf32>
    %27 = arith.addf %23, %26 : vector<16x32xf32>
    %c0_15 = arith.constant 0 : index
    %c0_16 = arith.constant 0 : index
    %28 = vector.load %arg8[%c0_15, %c0_16] : memref<16x32xf32, #tpu.memory_space<vmem>>, vector<16x32xf32>
    tpu.vector_store %arg8[%c0_15, %c0_16], %27 {strides = array<i32>} : memref<16x32xf32, #tpu.memory_space<vmem>>, vector<16x32xf32>,
    %c0_i32_17 = arith.constant 0 : i32
    %29 = arith.cmpi eq, %arg1, %c0_i32_17 : i32
    %30 = arith.extui %29 : i1 to i32
    %c0_i32_18 = arith.constant 0 : i32
    %31 = arith.cmpi ne, %30, %c0_i32_18 : i32
    scf.if %31 {
      %c0_19 = arith.constant 0 : index
      %c0_20 = arith.constant 0 : index
      %32 = vector.load %arg8[%c0_19, %c0_20] : memref<16x32xf32, #tpu.memory_space<vmem>>, vector<16x32xf32>
      %c0_21 = arith.constant 0 : index
      %c0_22 = arith.constant 0 : index
      %33 = vector.load %arg6[%c0_21, %c0_22] : memref<1x32xf32, #tpu.memory_space<vmem>>, vector<1x32xf32>
      %34 = vector.broadcast %33 : vector<1x32xf32> to vector<16x32xf32>
      %35 = arith.addf %32, %34 : vector<16x32xf32>
      %c0_23 = arith.constant 0 : index
      %c0_24 = arith.constant 0 : index
      %36 = vector.load %arg2[%c0_23, %c0_24] : memref<16x32xf32, #tpu.memory_space<vmem>>, vector<16x32xf32>
      %37 = arith.addf %35, %36 : vector<16x32xf32>
      %c0_25 = arith.constant 0 : index
      %c0_26 = arith.constant 0 : index
      %38 = vector.load %arg7[%c0_25, %c0_26] : memref<16x32xf32, #tpu.memory_space<vmem>>, vector<16x32xf32>
      tpu.vector_store %arg7[%c0_25, %c0_26], %37 {strides = array<i32>} : memref<16x32xf32, #tpu.memory_space<vmem>>, vector<16x32xf32>,
    } else {
    }
    return
  }
  func.func @transform_0(%arg0: i32, %arg1: i32) -> (i32, i32) {
    %c0_i32 = arith.constant 0 : i32
    %c0_i32_0 = arith.constant 0 : i32
    return %arg0, %c0_i32 : i32, i32
  }
  func.func @transform_1(%arg0: i32, %arg1: i32) -> (i32, i32) {
    %c0_i32 = arith.constant 0 : i32
    %c0_i32_0 = arith.constant 0 : i32
    return %c0_i32, %arg1 : i32, i32
  }
  func.func @transform_2(%arg0: i32, %arg1: i32) -> (i32, i32) {
    %c0_i32 = arith.constant 0 : i32
    %c0_i32_0 = arith.constant 0 : i32
    return %c0_i32, %arg1 : i32, i32
  }
  func.func @transform_3(%arg0: i32, %arg1: i32) -> (i32, i32) {
    %c0_i32 = arith.constant 0 : i32
    %c0_i32_0 = arith.constant 0 : i32
    return %arg1, %c0_i32 : i32, i32
  }
  func.func @transform_4(%arg0: i32, %arg1: i32) -> (i32, i32) {
    %c0_i32 = arith.constant 0 : i32
    %c0_i32_0 = arith.constant 0 : i32
    %c0_i32_1 = arith.constant 0 : i32
    return %c0_i32, %c0_i32_0 : i32, i32
  }
  func.func @transform_5(%arg0: i32, %arg1: i32) -> (i32, i32) {
    %c0_i32 = arith.constant 0 : i32
    %c0_i32_0 = arith.constant 0 : i32
    return %arg0, %c0_i32 : i32, i32
  }
}

</mosaic_0001>

<bundles_post_ra>
// kernel: residual_add_mlp.1
= control target key start
LH: loop header
LB: loop body
LE: loop exit
PB: predicated region body
PF: predicated region fallthrough
CT: control target
= control target key end

     0   :  { %v315_v1 = vmov 0.0   ;;  %vm316_vm0 = vmmov 0   ;;  %vm26_vm1 = vcmask 261120   ;;  %s407_s0 = inlined_call_operand.vmem [shape: f32[16,32], index: 0, kind: input, shape index: {}]   ;;  %s408_s1 = inlined_call_operand.vmem [shape: bf16[32,64], index: 1, kind: input, shape index: {}]   ;;  %s409_s2 = inlined_call_operand.vmem [shape: f32[1,64], index: 2, kind: input, shape index: {}]   ;;  %s410_s3 = inlined_call_operand.vmem [shape: bf16[64,32], index: 3, kind: input, shape index: {}]   ;;  %s411_s4 = inlined_call_operand.vmem [shape: f32[1,32], index: 4, kind: input, shape index: {}]   ;;  %s412_s5 = inlined_call_operand.hbm [shape: f32[16,32], index: 5, kind: output, shape index: {}]  }
   0x1   :  { %v281_v0 = vld [vmem:[%s408_s1] sm:$0xff]   ;;  %256 = vmatprep.subr.bf16.mxu0 %v315_v1  ;;  %264 = vmatprep.subr.bf16.mxu1 %v315_v1  ;;  %v282_v2 = vld [vmem:[%s408_s1 + $0x8] sm:$0xff]   ;;  %27 = vst.msk [vmem:[#allocation2] sm:$0xff] %vm26_vm1, %v315_v1  ;;  %28 = vst.msk [vmem:[#allocation2 + $0x8] sm:$0xff] %vm26_vm1, %v315_v1 }
   0x2   :  { %257 = vmatpush3.bf16.msra.mxu0 %v281_v0  ;;  %260 = vmatprep.mubr.msk.bf16.mxu0 %vm316_vm0, %v315_v1  ;;  %v359_v3 = vld [vmem:[%s407_s0] sm:$0xff]  ;;  %v364_v4 = vld [vmem:[%s407_s0 + $0x8] sm:$0xff] }
   0x3   :  { %258 = vmatprep.subr.bf16.mxu0 %v315_v1  ;;  %272 = vmatprep.mubr.msk.bf16.mxu1 %vm316_vm0, %v315_v1  ;;  %v31_v5 = vpack.c.bf16 %v364_v4, %v359_v3 }
   0x4   :  { %10 = vsyncpa [#allocation4], 0  ;;  %v283_v6 = vld [vmem:[%s410_s3] sm:$0xff]   ;;  %v284_v7 = vld [vmem:[%s410_s3 + $0x8] sm:$0xff]   ;;  %vm153_vm2 = vcmask 523264   ;;  %s317_s9 = smov [#allocation3]  }
   0x5   :  { %265 = vmatpush3.bf16.msra.mxu1 %v283_v6  ;;  %v285_v8 = vld [vmem:[%s410_s3 + $0x10] sm:$0xff]   ;;  %v286_v9 = vld [vmem:[%s410_s3 + $0x18] sm:$0xff]   ;;  %v238_v10 = vld [vmem:[%s409_s2] ss:$0 sm:$0xff]  ;;  %s227_s10 = sshll.u32 %s317_s9, 4  ;;  %s228_s10 = int_to_ptr.vmem [resolvable:$true] %s227_s10 }
   0x6   :  { %259 = vmatpush3.bf16.msra.mxu0 %v282_v2  ;;  %266 = vmatprep.subr.bf16.mxu1 %v315_v1  ;;  %v247_v44 = vld [vmem:[%s411_s4] ss:$0 sm:$0xff]  ;;  %s291_s11 = scalar_lea.vmem %s228_s10, 256  ;;  %p296_p1 = scmp.lt.s32.totalorder %s228_s10, %s228_s10 }
   0x7   :  { %p292_p0 = scmp.ne.s32.totalorder %s228_s10, %s291_s11  ;;  %p297_p2 = scmp.lt.s32.totalorder %s291_s11, %s291_s11 }
   0x8   :  { %v118_v36 = vld [vmem:[#allocation2] sm:$0xff]  ;;  %v119_v38 = vld [vmem:[#allocation2 + $0x8] sm:$0xff] }
   0x9   :  { %261 = vmatmul.mubr.msk.bf16.vlgmr.msra.gmra.mrb[0].mxu0 %vm26_vm1, %v31_v5  ;;  %267 = vmatpush3.bf16.msra.mxu1 %v284_v7  ;;  %p298_p3 = por %p297_p2, %p296_p1 }
   0xa   :  { %268 = vmatprep.subr.bf16.mxu1 %v315_v1 }
   0xb   :  { %p299_p4 = pnand %p298_p3, %p292_p0 }
   0xd   :  { %269 = vmatpush3.bf16.msra.mxu1 %v285_v8 }
   0xe   :  { %270 = vmatprep.subr.bf16.mxu1 %v315_v1 }
  0x11   :  { %271 = vmatpush3.bf16.msra.mxu1 %v286_v9 }
  0xdc   :  { %v93_v11 = vpop.f32.mrb[0].mxu0 }
  0xdd   :  { %v94_v12 = vadd.f32 %v238_v10, %v93_v11  ;;  %v262_v13 = vpop.f32.mrb[1].mxu0 }
  0xde   :  { %v96_v14 = vpop.f32.mrb[2].mxu0 }
  0xdf   :  { %v100_v15 = vmul.f32 %v94_v12, %v94_v12  ;;  %v97_v16 = vadd.f32 %v238_v10, %v96_v14  ;;  %v263_v17 = vpop.f32.mrb[3].mxu0 }
  0xe1   :  { %v102_v18 = vmul.f32 %v100_v15, %v94_v12  ;;  %v101_v19 = vmul.f32 %v97_v16, %v97_v16 }
  0xe3   :  { %v104_v20 = vmul.f32 0.044715, %v102_v18  ;;  %v103_v21 = vmul.f32 %v101_v19, %v97_v16 }
  0xe5   :  { %v106_v22 = vadd.f32 %v104_v20, %v94_v12  ;;  %v105_v23 = vmul.f32 0.044715, %v103_v21 }
  0xe7   :  { %v108_v24 = vmul.f32 0.7978846, %v106_v22  ;;  %v107_v25 = vadd.f32 %v105_v23, %v97_v16 }
  0xe9   :  { %287 = vtanh.f32 %v108_v24  ;;  %v109_v26 = vmul.f32 0.7978846, %v107_v25 }
  0xeb   :  { %289 = vtanh.f32 %v109_v26 }
  0xf3   :  { %v288_v27 = vpop.eup %287 }
  0xf4   :  { %v112_v28 = vadd.f32 1.0, %v288_v27 }
  0xf5   :  { %v290_v29 = vpop.eup %289 }
  0xf6   :  { %v114_v30 = vmul.f32 0.5, %v112_v28  ;;  %v113_v31 = vadd.f32 1.0, %v290_v29 }
  0xf8   :  { %v115_v32 = vmul.f32 0.5, %v113_v31  ;;  %v116_v33 = vmul.f32 %v114_v30, %v94_v12 }
  0xfa   :  { %v117_v34 = vmul.f32 %v115_v32, %v97_v16 }
  0xfc   :  { %v120_v35 = vpack.c.bf16 %v117_v34, %v116_v33 }
  0xfe   :  { %273 = vmatmul.mubr.msk.bf16.vlgmr.msra.gmra.mrb[0].mxu1 %vm153_vm2, %v120_v35 }
 0x1d1   :  { %v191_v37 = vpop.f32.mrb[0].mxu1 }
 0x1d2   :  { %v198_v39 = vadd.f32 %v191_v37, %v118_v36  ;;  %v274_v40 = vpop.f32.mrb[1].mxu1 }
 0x1d3   :  { %v194_v41 = vpop.f32.mrb[2].mxu1 }
 0x1d4   :  { %200 = vst.msk [vmem:[#allocation2] sm:$0xff] %vm26_vm1, %v198_v39  ;;  %v199_v42 = vadd.f32 %v194_v41, %v119_v38  ;;  %v275_v43 = vpop.f32.mrb[3].mxu1 }
 0x1d6   :  { %201 = vst.msk [vmem:[#allocation2 + $0x8] sm:$0xff] %vm26_vm1, %v199_v42 }
 0x1db   :  { %v205_v45 = vld [vmem:[#allocation2] sm:$0xff] }
 0x1dc   :  { %v214_v46 = vadd.f32 %v247_v44, %v205_v45 }
 0x1dd   :  { %v206_v47 = vld [vmem:[#allocation2 + $0x8] sm:$0xff] }
 0x1de   :  { %v215_v48 = vadd.f32 %v247_v44, %v206_v47  ;;  %v218_v49 = vadd.f32 %v214_v46, %v359_v3 }
 0x1e0   :  { %v219_v50 = vadd.f32 %v215_v48, %v364_v4  ;;  %220 = vst.msk [vmem:[#allocation3] sm:$0xff] %vm26_vm1, %v218_v49 }
 0x1e2   :  { %221 = vst.msk [vmem:[#allocation3 + $0x8] sm:$0xff] %vm26_vm1, %v219_v50 }
 0x1e3   :  { %302 = shalt.err (!%p299_p4)
}
 0x1e4   :  { %s303_s13 = scalar_lea.hbm %s412_s5, 256 }
 0x1e5   :  { %p304_p5 = scmp.ne.s32.totalorder %s412_s5, %s303_s13  ;;  %p307_p6 = scmp.lt.u32.totalorder %s303_s13, %s412_s5 }
 0x1e7   :  { %p309_p7 = pnand %p307_p6, %p304_p5 }
 0x1e9   :  { %312 = shalt.err (!%p309_p7)
}
 0x1ea   :  { %s318_s18 = smov 128   ;;  %s319_s19 = smov 8  }
 0x1eb   :  { %233 = dma.vmem_to_hbm [thread:$0]  %s228_s10, 256, %s412_s5, [#allocation4], %s318_s18, %s318_s18, %s319_s19  }
 0x1ec   :  { %313 = dma.done.wait [#allocation4], 256  }
 0x1ed   :  { %314 = vsyncadd [#allocation4], 4294967040 }
 0x1ee   :  { %237 = vsyncpa [#allocation4], 1 }

</bundles_post_ra>
